<compile_context>
chip_gen: v6e
topology: v6e:2x2x1
jax: 0.10.0
libtpu: 0.0.40
codegen_flags: <defaults>
</compile_context>

<pallas_src>
import functools

import jax
import jax.numpy as jnp
from jax.experimental import pallas as pl
from jax.experimental.pallas import tpu as pltpu


def _round_up(x, m):
    return (x + m - 1) // m * m


def _conv_bn_act_kernel(x_ref, w_ref, b_ref, o_ref, z_ref, *, activation):
    """One (batch, time-tile) grid point.

    x_ref: (1, Tp_in, C_in)       zero-padded input, channels-last, compute dtype (bf16)
    w_ref: (C_in, K * Cout_p)     BN-folded conv weight, taps concatenated along lanes
    b_ref: (1, Cout_p)            folded bias = (conv_b - mean) * scale + beta   (f32)
    o_ref: (1, tT, Cout_p)        output tile (f32)
    z_ref: (tT + halo, K*Cout_p)  f32 VMEM scratch for the per-tile matmul result
    """
    tT = o_ref.shape[1]
    cout_p = o_ref.shape[2]
    w_rows = z_ref.shape[0]                    # tT + halo
    k_taps = z_ref.shape[1] // cout_p          # K

    j = pl.program_id(1)
    start = pl.multiple_of(j * tT, 8)          # tT is a multiple of the sublane tile

    # (tT + halo, C_in) window of the padded input; start is sublane-aligned.
    win = x_ref[0, pl.ds(start, w_rows), :]

    # One MXU matmul covering all K taps:
    #   z[s, k*Cout_p + co] = sum_ci win[s, ci] * w[k, ci, co]
    z_ref[...] = jnp.dot(win, w_ref[...], preferred_element_type=jnp.float32)

    # Combine taps: y[t, co] = sum_k z[t + k, k*Cout_p + co].
    # Lane slices are 128-aligned; row shifts are small static sublane offsets.
    acc = z_ref[0:tT, 0:cout_p]
    for k in range(1, k_taps):
        acc = acc + z_ref[k:k + tT, k * cout_p:(k + 1) * cout_p]

    y = acc + b_ref[...]                       # folded BN bias, f32
    if activation == "relu":
        y = jnp.maximum(y, 0.0)
    elif activation == "tanh":
        y = jnp.tanh(y)
    # else: identity

    o_ref[0] = y.astype(o_ref.dtype)


def conv_bn_block(x, conv_w, conv_b, gamma, beta, running_mean, running_var,
                  *, eps=1e-5, activation="relu", compute_dtype=jnp.bfloat16):
    """Inference-mode ConvBNBlock forward.

    x:      (B, C_in, T)      float32
    conv_w: (C_out, C_in, K)  float32 (PyTorch Conv1d weight layout)
    conv_b, gamma, beta, running_mean, running_var: (C_out,)
    returns (B, C_out, T) float32
    """
    if activation == "None":
        activation = None
    assert activation in ("relu", "tanh", None)

    B, C_in, T = x.shape
    C_out, c_in_w, K = conv_w.shape
    assert c_in_w == C_in
    assert (K - 1) % 2 == 0, "Keep the length unchanged."
    pad = (K - 1) // 2

    LANE = 128
    SUB = 8 * (4 // jnp.dtype(compute_dtype).itemsize)      # 16 for bf16, 8 for f32

    # ---- BN folding (f32, wrapper side): scale into the weights, bias kept separate ----
    scale = gamma / jnp.sqrt(running_var + eps)                      # (C_out,)
    w_folded = conv_w.astype(jnp.float32) * scale[:, None, None]     # (C_out, C_in, K)
    bias = (conv_b - running_mean) * scale + beta                    # (C_out,)

    # ---- tiling: lane-pad C_out, sublane-tile T ----
    Cout_p = _round_up(C_out, LANE)
    base_tile = 256
    n0 = max(1, pl.cdiv(T, base_tile))
    tT = _round_up(pl.cdiv(T, n0), SUB)        # time-tile rows (multiple of sublane tile)
    nT = pl.cdiv(T, tT)
    T_out_pad = nT * tT
    halo = _round_up(K - 1, SUB)
    Tp_in = T_out_pad + halo                   # padded input length ('same' halo included)

    # ---- layout glue (plain JAX) ----
    x_tlc = jnp.transpose(x, (0, 2, 1)).astype(compute_dtype)          # (B, T, C_in)
    x_pad = jnp.pad(x_tlc, ((0, 0), (pad, Tp_in - T - pad), (0, 0)))   # (B, Tp_in, C_in)

    # w_wide[ci, k*Cout_p + co] = w_folded[co, ci, k]
    w_kco = jnp.transpose(w_folded, (2, 1, 0))                         # (K, C_in, C_out)
    w_kco = jnp.pad(w_kco, ((0, 0), (0, 0), (0, Cout_p - C_out)))      # (K, C_in, Cout_p)
    w_wide = (jnp.transpose(w_kco, (1, 0, 2))
              .reshape(C_in, K * Cout_p).astype(compute_dtype))        # (C_in, K*Cout_p)

    bias_p = jnp.pad(bias, (0, Cout_p - C_out)).reshape(1, Cout_p).astype(jnp.float32)

    kernel = functools.partial(_conv_bn_act_kernel, activation=activation)

    out_btc = pl.pallas_call(
        kernel,
        out_shape=jax.ShapeDtypeStruct((B, T_out_pad, Cout_p), jnp.float32),
        grid_spec=pltpu.PrefetchScalarGridSpec(
            num_scalar_prefetch=0,
            grid=(B, nT),
            in_specs=[
                # Whole padded sequence of one batch element; index map is invariant in
                # the T-tile axis, so the block is fetched once per batch element.
                pl.BlockSpec((1, Tp_in, C_in), lambda b, j: (b, 0, 0)),
                # Constant-index (resident) operands: folded weights + folded bias.
                pl.BlockSpec((C_in, K * Cout_p), lambda b, j: (0, 0)),
                pl.BlockSpec((1, Cout_p), lambda b, j: (0, 0)),
            ],
            out_specs=pl.BlockSpec((1, tT, Cout_p), lambda b, j: (b, j, 0)),
            scratch_shapes=[pltpu.VMEM((tT + halo, K * Cout_p), jnp.float32)],
        ),
        compiler_params=pltpu.CompilerParams(
            dimension_semantics=("parallel", "parallel"),
            vmem_limit_bytes=48 * 1024 * 1024,
        ),
    )(x_pad, w_wide, bias_p)

    out = out_btc[:, :T, :C_out]               # drop T / C_out padding
    return jnp.transpose(out, (0, 2, 1))       # (B, C_out, T)


# ----------------------------- references for testing -----------------------------

def _activation_fn(y, activation):
    if activation == "relu":
        return jnp.maximum(y, 0.0)
    if activation == "tanh":
        return jnp.tanh(y)
    return y


def _reference_f32(x, conv_w, conv_b, gamma, beta, running_mean, running_var,
                   *, eps=1e-5, activation="relu"):
    """Exact f32 semantics of the PyTorch module (inference)."""
    pad = (conv_w.shape[2] - 1) // 2
    y = jax.lax.conv_general_dilated(
        x, conv_w, window_strides=(1,), padding=[(pad, pad)],
        dimension_numbers=("NCH", "OIH", "NCH"),
        precision=jax.lax.Precision.HIGHEST,
    ) + conv_b[None, :, None]
    scale = gamma / jnp.sqrt(running_var + eps)
    y = (y - running_mean[None, :, None]) * scale[None, :, None] + beta[None, :, None]
    return _activation_fn(y, activation)


def _reference_quantized(x, conv_w, conv_b, gamma, beta, running_mean, running_var,
                         *, eps=1e-5, activation="relu", compute_dtype=jnp.bfloat16):
    """Mirror of the kernel numerics: BN scale folded into w, operands rounded to
    compute_dtype, f32 accumulation, f32 bias/activation."""
    if activation == "None":
        activation = None
    pad = (conv_w.shape[2] - 1) // 2
    scale = gamma / jnp.sqrt(running_var + eps)
    w_eff = ((conv_w.astype(jnp.float32) * scale[:, None, None])
             .astype(compute_dtype).astype(jnp.float32))
    bias = (conv_b - running_mean) * scale + beta
    x_q = x.astype(compute_dtype).astype(jnp.float32)
    y = jax.lax.conv_general_dilated(
        x_q, w_eff, window_strides=(1,), padding=[(pad, pad)],
        dimension_numbers=("NCH", "OIH", "NCH"),
        precision=jax.lax.Precision.HIGHEST,
    ) + bias[None, :, None]
    return _activation_fn(y, activation)


if __name__ == "__main__":
    # Small shapes consistent with ConvBNBlock: input (B, C_in, T).
    B, C_in, C_out, T, K = 2, 4, 8, 16, 5

    key = jax.random.PRNGKey(0)
    k_x, k_w, k_b, k_g, k_be, k_m, k_v = jax.random.split(key, 7)

    x = jax.random.normal(k_x, (B, C_in, T), dtype=jnp.float32)
    conv_w = 0.1 * jax.random.normal(k_w, (C_out, C_in, K), dtype=jnp.float32)
    conv_b = 0.1 * jax.random.normal(k_b, (C_out,), dtype=jnp.float32)
    gamma = 1.0 + 0.1 * jax.random.normal(k_g, (C_out,), dtype=jnp.float32)
    beta = 0.1 * jax.random.normal(k_be, (C_out,), dtype=jnp.float32)
    running_mean = 0.1 * jax.random.normal(k_m, (C_out,), dtype=jnp.float32)
    running_var = jnp.abs(jax.random.normal(k_v, (C_out,), dtype=jnp.float32)) + 0.5

    args = (x, conv_w, conv_b, gamma, beta, running_mean, running_var)

    for act in ("relu", "tanh", None):
        out = conv_bn_block(*args, activation=act)
        out = jax.block_until_ready(out)
        assert out.shape == (B, C_out, T)

        # Tight check vs. a reference that mirrors the kernel's bf16-operand numerics.
        ref_q = _reference_quantized(*args, activation=act)
        assert jnp.allclose(out, ref_q, atol=5e-4, rtol=5e-4), (
            f"mismatch vs bf16-quantized reference (activation={act})")

        # Loose check vs. exact f32 module semantics (bf16 operand rounding ~1e-3).
        ref_f = _reference_f32(*args, activation=act)
        assert jnp.allclose(out, ref_f, atol=2e-2, rtol=2e-2), (
            f"mismatch vs f32 reference (activation={act})")

    print("KERNEL_OK")
</pallas_src>

<mosaic_0001>
module attributes {stable_mosaic.version = 11 : i64} {
  func.func @_conv_bn_act_kernel(%arg0: i32, %arg1: i32, %arg2: memref<1x32x4xbf16, #tpu.memory_space<vmem>>, %arg3: memref<4x640xbf16, #tpu.memory_space<vmem>>, %arg4: memref<1x128xf32, #tpu.memory_space<vmem>>, %arg5: memref<1x16x128xf32, #tpu.memory_space<vmem>>, %arg6: memref<32x640xf32, #tpu.memory_space<vmem>>) attributes {dimension_semantics = [#tpu.dimension_semantics<parallel>, #tpu.dimension_semantics<parallel>], iteration_bounds = array<i64: 2, 1>, scalar_prefetch = 0 : i64, scratch_operands = 1 : i64, tpu.core_type = #tpu.core_type<tc>, window_params = [{transform_indices = @transform_0, window_bounds = array<i64: 1, 32, 4>}, {pipeline_mode = #tpu.pipeline_mode<synchronous>, transform_indices = @transform_1, window_bounds = array<i64: 4, 640>}, {pipeline_mode = #tpu.pipeline_mode<synchronous>, transform_indices = @transform_2, window_bounds = array<i64: 1, 128>}, {transform_indices = @transform_3, window_bounds = array<i64: 1, 16, 128>}]} {
    %c16_i32 = arith.constant 16 : i32
    %0 = arith.muli %arg1, %c16_i32 : i32
    %1 = tpu.assume_multiple %0, 8 : i32
    %c0 = arith.constant 0 : index
    %2 = arith.index_cast %1 : i32 to index
    %c0_0 = arith.constant 0 : index
    %3 = vector.load %arg2[%c0, %2, %c0_0] : memref<1x32x4xbf16, #tpu.memory_space<vmem>>, vector<1x32x4xbf16>
    %4 = vector.shape_cast %3 : vector<1x32x4xbf16> to vector<32x4xbf16>
    %c0_1 = arith.constant 0 : index
    %c0_2 = arith.constant 0 : index
    %5 = vector.load %arg3[%c0_1, %c0_2] : memref<4x640xbf16, #tpu.memory_space<vmem>>, vector<4x640xbf16>
    %cst = arith.constant dense<0.000000e+00> : vector<32x640xf32>
    %6 = tpu.matmul %4, %5, %cst {dimension_numbers = #tpu.dot_dimension_numbers<[1], [0], [0], [1], [0, 0, 1, 1], [], []>} : vector<32x4xbf16>, vector<4x640xbf16>, vector<32x640xf32> -> vector<32x640xf32>
    %c0_3 = arith.constant 0 : index
    %c0_4 = arith.constant 0 : index
    %7 = vector.load %arg6[%c0_3, %c0_4] : memref<32x640xf32, #tpu.memory_space<vmem>>, vector<32x640xf32>
    tpu.vector_store %arg6[%c0_3, %c0_4], %6 {strides = array<i32>} : memref<32x640xf32, #tpu.memory_space<vmem>>, vector<32x640xf32>,
    %c0_5 = arith.constant 0 : index
    %c0_6 = arith.constant 0 : index
    %8 = vector.load %arg6[%c0_5, %c0_6] : memref<32x640xf32, #tpu.memory_space<vmem>>, vector<16x128xf32>
    %c1 = arith.constant 1 : index
    %c128 = arith.constant 128 : index
    %9 = vector.load %arg6[%c1, %c128] : memref<32x640xf32, #tpu.memory_space<vmem>>, vector<16x128xf32>
    %10 = arith.addf %8, %9 : vector<16x128xf32>
    %c2 = arith.constant 2 : index
    %c256 = arith.constant 256 : index
    %11 = vector.load %arg6[%c2, %c256] : memref<32x640xf32, #tpu.memory_space<vmem>>, vector<16x128xf32>
    %12 = arith.addf %10, %11 : vector<16x128xf32>
    %c3 = arith.constant 3 : index
    %c384 = arith.constant 384 : index
    %13 = vector.load %arg6[%c3, %c384] : memref<32x640xf32, #tpu.memory_space<vmem>>, vector<16x128xf32>
    %14 = arith.addf %12, %13 : vector<16x128xf32>
    %c4 = arith.constant 4 : index
    %c512 = arith.constant 512 : index
    %15 = vector.load %arg6[%c4, %c512] : memref<32x640xf32, #tpu.memory_space<vmem>>, vector<16x128xf32>
    %16 = arith.addf %14, %15 : vector<16x128xf32>
    %c0_7 = arith.constant 0 : index
    %c0_8 = arith.constant 0 : index
    %17 = vector.load %arg4[%c0_7, %c0_8] : memref<1x128xf32, #tpu.memory_space<vmem>>, vector<1x128xf32>
    %18 = vector.broadcast %17 : vector<1x128xf32> to vector<16x128xf32>
    %19 = arith.addf %16, %18 : vector<16x128xf32>
    %cst_9 = arith.constant 0.000000e+00 : f32
    %20 = vector.broadcast %cst_9 : f32 to vector<16x128xf32>
    %21 = arith.maximumf %19, %20 : vector<16x128xf32>
    %c0_10 = arith.constant 0 : index
    %c0_11 = arith.constant 0 : index
    %c0_12 = arith.constant 0 : index
    %22 = vector.load %arg5[%c0_10, %c0_11, %c0_12] : memref<1x16x128xf32, #tpu.memory_space<vmem>>, vector<1x16x128xf32>
    %23 = vector.shape_cast %22 : vector<1x16x128xf32> to vector<16x128xf32>
    %24 = vector.shape_cast %21 : vector<16x128xf32> to vector<1x16x128xf32>
    tpu.vector_store %arg5[%c0_10, %c0_11, %c0_12], %24 {strides = array<i32>} : memref<1x16x128xf32, #tpu.memory_space<vmem>>, vector<1x16x128xf32>,
    return
  }
  func.func @transform_0(%arg0: i32, %arg1: i32) -> (i32, i32, i32) {
    %c0_i32 = arith.constant 0 : i32
    %c0_i32_0 = arith.constant 0 : i32
    %c0_i32_1 = arith.constant 0 : i32
    return %arg0, %c0_i32, %c0_i32_0 : i32, i32, i32
  }
  func.func @transform_1(%arg0: i32, %arg1: i32) -> (i32, i32) {
    %c0_i32 = arith.constant 0 : i32
    %c0_i32_0 = arith.constant 0 : i32
    %c0_i32_1 = arith.constant 0 : i32
    return %c0_i32, %c0_i32_0 : i32, i32
  }
  func.func @transform_2(%arg0: i32, %arg1: i32) -> (i32, i32) {
    %c0_i32 = arith.constant 0 : i32
    %c0_i32_0 = arith.constant 0 : i32
    %c0_i32_1 = arith.constant 0 : i32
    return %c0_i32, %c0_i32_0 : i32, i32
  }
  func.func @transform_3(%arg0: i32, %arg1: i32) -> (i32, i32, i32) {
    %c0_i32 = arith.constant 0 : i32
    %c0_i32_0 = arith.constant 0 : i32
    return %arg0, %arg1, %c0_i32 : i32, i32, i32
  }
}

</mosaic_0001>

<bundles_post_ra>
// kernel: tpu_custom_call.1
= control target key start
LH: loop header
LB: loop body
LE: loop exit
PB: predicated region body
PF: predicated region fallthrough
CT: control target
= control target key end

     0   :  { %8 = vsyncpa [#allocation4], 0  ;;  %s931_s0 = inlined_call_operand.vmem [shape: bf16[2,32,4], index: 0, kind: input, shape index: {}]   ;;  %s932_s1 = inlined_call_operand.vmem [shape: bf16[4,640], index: 1, kind: input, shape index: {}]   ;;  %s933_s2 = inlined_call_operand.vmem [shape: f32[1,128], index: 2, kind: input, shape index: {}]   ;;  %s934_s3 = inlined_call_operand.hbm [shape: f32[2,16,128], index: 3, kind: output, shape index: {}]  }
   0x1   :  { %10 = vsyncpa [#allocation4 + $0x1], 0  ;;  %s802_s12 = smov 0   ;;  %s804_s13 = smov 0  }
   0x2   :  { %s806_s14 = smov 0   ;;  %s808_s15 = smov 0  }
   0x3   :  { %s810_s16 = smov 0   ;;  %s812_s17 = smov 0  }
   0x4 LB: > { %s600_s18 = sadd.s32 4294967295, %s775_s17   ;;  %s601_s19 = sadd.s32 4294967294, %s775_s17   ;;  %s775_s17 = sphi %s812_s17, %s16_s17   ;;  %s771_s16 = sphi %s810_s16, %s941_s16   ;;  %s767_s15 = sphi %s808_s15, %s940_s15   ;;  %s763_s14 = sphi %s806_s14, %s939_s14   ;;  %s759_s13 = sphi %s804_s13, %s938_s13   ;;  %s755_s12 = sphi %s802_s12, %s937_s12  }
   0x5   : > { %s28_s20 = sadd.s32 1, %s771_s16  ;;  %s105_s21 = sadd.s32 1, %s763_s14 }
   0x6   : > { %p30_p0 = scmp.ge.s32.totalorder %s28_s20, 2  ;;  %p115_p1 = scmp.ne.s32.totalorder %s763_s14, %s759_s13 }
   0x7   : > { %p116_p2 = scmp.eq.s32.totalorder %s600_s18, 1  ;;  %p121_p3 = scmp.ne.s32.totalorder %s759_s13, %s755_s12 }
   0x8   : > { %s943_s20 = smov (%p30_p0, %s28_s20), 0  ;;  %p122_p5 = scmp.eq.s32.totalorder %s601_s19, 1 }
   0x9   : > { %p842_p4 = por %p116_p2, %p115_p1  ;;  %s100_s23 = ssub.s32 %s771_s16, %s943_s20 }
   0xa   : > { %p604_p6 = scmp.ge.s32.totalorder %s775_s17, 1  ;;  %p103_p7 = scmp.eq.s32.totalorder %s100_s23, 0 }
   0xb   : > { %p849_p8 = por %p122_p5, %p121_p3  ;;  %p154_p9 = scmp.lt.s32.totalorder %s775_s17, 3 }
   0xc   : > { %s855_s25 = scalar_select %p103_p7, %s763_s14, %s105_s21  }
   0xd   : > { %p155_p10 = pnand %p604_p6, %p154_p9 }
   0xe   : > { %p178_p11 = scmp.lt.s32.totalorder (!%p155_p10), %s767_s15, 1  ;;  %s175_s8 = sand.u32 (!%p155_p10), 1, %s759_s13  }
   0xf   : > { %158 = sbr.rel (%p155_p10) target bundleno = 277 (0x115), region = 32  ;;  %s605_s9 = sshll.u32 (!%p155_p10), %s175_s8, 4 }
  0x10   : > { %s626_s18 = sshll.u32 (!%p155_p10), %s767_s15, 8  ;;  %s177_s19 = scalar_lea.vmem (!%p155_p10), [#allocation3], %s605_s9 }
  0x11   : > { %s525_s21 = sshll.u32 (!%p155_p10), %s177_s19, 4  ;;  %s880_s27 = scalar_lea.hbm (!%p155_p10), %s934_s3, %s626_s18  ;;  %s882_s21 = int_to_ptr.vmem [resolvable:$true] %s525_s21 }
  0x14   : > { %v194_v0 = vld [vmem:[%s932_s1] sm:$0xff]  ;;  %v212_v1 = vlaneseq  ;;  %v777_v2 = vmov 1983009808   ;;  %v778_v4 = vmov 0   ;;  %s179_s28 = scalar_select %p178_p11, %s767_s15, 1  ;;  %vm239_vm0 = vcmask 1041408  }
  0x15   : > { %v210_v3 = vunpack.c.l.s4 %v777_v2  ;;  %287 = vmatprep.mubr.bf16.mxu0 %v778_v4  ;;  %340 = vmatprep.mubr.bf16.mxu1 %v778_v4  ;;  %v208_v7 = vcombine.high %v194_v0, %v194_v0  ;;  %v610_v15 = vld.sshfl [vmem:[%s932_s1 + $0x8] sm:$0x3 pattern:$0x76325410]  ;;  %vm232_vm1 = vcmask 31744   ;;  %vm438_vm2 = vcmask 1046528  }
  0x16   : > { %v213_v5 = vshrl.u32 %v212_v1, 7  ;;  %s625_s29 = sshll.u32 %s179_s28, 4  ;;  %v253_v17 = vsel %vm239_vm0, %v610_v15, 0  ;;  %vm454_vm3 = vcmask 1045504   ;;  %vm470_vm4 = vcmask 1044480   ;;  %s886_s28 = scalar_lea.sflag [#allocation4], %s175_s8 }
  0x17   : > { %v211_v6 = vunpack.c.0.s8 %v210_v3  ;;  %s182_s5 = scalar_lea.vmem %s931_s0, %s625_s29  ;;  %vm486_vm5 = vcmask 1043456   ;;  %s699_s15 = scalar_lea.vmem %s882_s21, 256 }
  0x18   : > { %v697_v16 = vld [vmem:[%s182_s5] sm:$0xff]   ;;  %v698_v18 = vld [vmem:[%s182_s5 + $0x8] sm:$0xff]   ;;  %p700_p12 = scmp.ne.s32.totalorder %s882_s21, %s699_s15  ;;  %s779_s29 = smov [#allocation3]  }
  0x19   : > { %v214_v8 = vsub.s32 %v211_v6, %v213_v5  ;;  %s703_s30 = sshll.u32 %s779_s29, 4  ;;  %s704_s30 = int_to_ptr.vmem [resolvable:$false] %s703_s30 }
  0x1a   : > { %p701_p13 = pnand %p700_p12, %p842_p4  ;;  %s705_s4 = scalar_lea.vmem %s704_s30, 512 }
  0x1b   : > { %v215_v9 = vrot.slane %v194_v0, %v214_v8  ;;  %v222_v10 = vrot.slane %v208_v7, %v214_v8  ;;  %v619_v7 = vld [vmem:[%s933_s2] ss:$0 sm:$0xff]  ;;  %p706_p1 = scmp.lt.s32.totalorder %s882_s21, %s704_s30  ;;  %p707_p2 = scmp.lt.s32.totalorder %s705_s4, %s699_s15 }
  0x1c   : > { %p702_p0 = pneg %p701_p13 }
  0x1d   : > { %v223_v11 = vcombine.high %v215_v9, %v215_v9  ;;  %v241_v12 = vsel %vm239_vm0, %v215_v9, 0  ;;  %v224_v13 = vcombine.high %v222_v10, %v222_v10  ;;  %v247_v14 = vsel %vm239_vm0, %v222_v10, 0  ;;  %p708_p3 = por %p707_p2, %p706_p1 }
  0x1f   : > { %611 = vmatprep.subr.msk.bf16.mxu0 %vm239_vm0, %v223_v11  ;;  %614 = vmatprep.subr.msk.bf16.mxu1 %vm239_vm0, %v224_v13  ;;  %p709_p5 = pnand %p708_p3, %p702_p0 }
  0x20   : > { %270 = vmatpush1.bf16.msra.mxu0 %v241_v12  ;;  %323 = vmatpush1.bf16.msra.mxu1 %v247_v14 }
  0x21   : > { %636 = vmatprep.subr.msk.bf16.mxu0 %vm239_vm0, %v610_v15 }
  0x23   : > { %612 = vmatmul.mubr.msk.bf16.vlgmr.msra.gmra.mxu0 %vm232_vm1, %v697_v16  ;;  %615 = vmatmul.mubr.msk.bf16.vlgmr.msra.gmra.mxu1 %vm232_vm1, %v697_v16 }
  0x24   : > { %631 = vmatpush3.bf16.msra.mxu0 %v253_v17  ;;  %297 = vmatprep.mubr.bf16.mxu0 %v778_v4 }
  0x25   : > { %350 = vmatprep.mubr.bf16.mxu1 %v778_v4 }
  0x2b   : > { %613 = vmatmul.mubr.msk.bf16.gmra.mxu0 %vm232_vm1, %v698_v18  ;;  %616 = vmatmul.mubr.msk.bf16.gmra.mxu1 %vm232_vm1, %v698_v18 }
  0x2c   : > { %632 = vmatprep.mubr.msk.bf16.mxu0 %vm232_vm1, %v697_v16 }
  0x33   : > { %633 = vmatmul.mubr.msk.bf16.vlgmr.msra.gmra.mxu0 %vm232_vm1, %v698_v18 }
  0xe3   : > { %v289_v19 = vpop.f32.mrf.mxu0  ;;  %v342_v20 = vpop.f32.mrf.mxu1 }
  0xe4   : > { %412 = vst [vmem:[#allocation2 + $0x50] sm:$0xff] %v342_v20 }
  0xe5   : > { %v291_v21 = vpop.f32.mrf.mxu0  ;;  %v344_v22 = vpop.f32.mrf.mxu1 }
  0xe6   : > { %411 = vst [vmem:[#allocation2 + $0x38] sm:$0xff] %v291_v21  ;;  %413 = vst [vmem:[#allocation2 + $0x18] sm:$0xff] %v344_v22 }
  0xe7   : > { %v293_v23 = vpop.f32.mrf.mxu0  ;;  %v346_v24 = vpop.f32.mrf.mxu1 }
  0xe8   : > { %v456_v52 = vrot.slane %v346_v24, 2 }
  0xe9   : > { %v295_v25 = vpop.f32.mrf.mxu0  ;;  %v348_v26 = vpop.f32.mrf.mxu1 }
  0xea   : > { %v440_v37 = vrot.slane %v295_v25, 1  ;;  %v472_v59 = vrot.slane %v348_v26, 3 }
  0xeb   : > { %v299_v27 = vpop.f32.mrf.mxu0  ;;  %v352_v28 = vpop.f32.mrf.mxu1  ;;  %v448_v39 = vld [vmem:[#allocation2 + $0x50] sm:$0xfc] }
  0xec   : > { %422 = vst [vmem:[#allocation2 + $0x58] sm:$0xff] %v352_v28  ;;  %v455_v46 = vrot.slane %v448_v39, 2 }
  0xed   : > { %v301_v29 = vpop.f32.mrf.mxu0  ;;  %v354_v30 = vpop.f32.mrf.mxu1  ;;  %v432_v31 = vld [vmem:[#allocation2 + $0x38] sm:$0xfe] }
  0xee   : > { %421 = vst [vmem:[#allocation2 + $0x40] sm:$0xff] %v301_v29  ;;  %423 = vst [vmem:[#allocation2 + $0x10] sm:$0xff] %v354_v30  ;;  %v439_v34 = vrot.slane %v432_v31, 1  ;;  %v464_v50 = vld [vmem:[#allocation2 + $0x18] sm:$0xf8]  ;;  %v457_v56 = vsel %vm454_vm3, %v455_v46, %v456_v52 }
  0xef   : > { %v303_v32 = vpop.f32.mrf.mxu0  ;;  %v356_v33 = vpop.f32.mrf.mxu1  ;;  %v471_v58 = vrot.slane %v464_v50, 3 }
  0xf0   : > { %v441_v41 = vsel %vm438_vm2, %v439_v34, %v440_v37 }
  0xf1   : > { %v305_v35 = vpop.f32.mrf.mxu0  ;;  %v358_v36 = vpop.f32.mrf.mxu1  ;;  %v446_v49 = vadd.f32 %v441_v41, %v289_v19  ;;  %v473_v4 = vsel %vm470_vm4, %v471_v58, %v472_v59 }
  0xf3   : > { %v634_v38 = vpop.f32.mrf.mxu0  ;;  %v450_v40 = vld [vmem:[#allocation2 + $0x58] sm:$0x3]  ;;  %v462_v60 = vadd.f32 %v457_v56, %v446_v49 }
  0xf4   : > { %424 = vst [vmem:[#allocation2 + $0x98] sm:$0xff] %v634_v38  ;;  %v458_v47 = vrot.slane %v450_v40, 2 }
  0xf5   : > { %v395_v42 = vpop.f32.mrf.mxu0  ;;  %v434_v43 = vld [vmem:[#allocation2 + $0x40] sm:$0x1]  ;;  %v466_v44 = vld [vmem:[#allocation2 + $0x10] sm:$0x7]  ;;  %v478_v8 = vadd.f32 %v473_v4, %v462_v60 }
  0xf6   : > { %414 = vst [vmem:[#allocation2 + $0x30] sm:$0xff] %v395_v42  ;;  %v442_v45 = vrot.slane %v434_v43, 1  ;;  %v474_v53 = vrot.slane %v466_v44, 3  ;;  %v459_v57 = vsel %vm454_vm3, %v456_v52, %v458_v47 }
  0xf7   : > { %v635_v48 = vpop.f32.mrf.mxu0 }
  0xf8   : > { %v443_v51 = vsel %vm438_vm2, %v440_v37, %v442_v45  ;;  %v475_v63 = vsel %vm470_vm4, %v472_v59, %v474_v53 }
  0xf9   : > { %v398_v54 = vpop.f32.mrf.mxu0  ;;  %v447_v55 = vadd.f32 %v443_v51, %v293_v23 }
  0xfa   : > { %v488_v0 = vrot.slane %v398_v54, 4 }
  0xfb   : > { %v463_v61 = vadd.f32 %v459_v57, %v447_v55  ;;  %v482_v62 = vld [vmem:[#allocation2 + $0x98] sm:$0xf] }
  0xfc   : > { %v490_v1 = vrot.slane %v482_v62, 4 }
  0xfd   : > { %v479_v2 = vadd.f32 %v475_v63, %v463_v61  ;;  %v480_v3 = vld [vmem:[#allocation2 + $0x30] sm:$0xf0] }
  0xfe   : > { %v487_v5 = vrot.slane %v480_v3, 4  ;;  %v491_v6 = vsel %vm486_vm5, %v488_v0, %v490_v1 }
  0xff   : > { %v495_v9 = vadd.f32 %v491_v6, %v479_v2 }
 0x100   : > { %v489_v10 = vsel %vm486_vm5, %v487_v5, %v488_v0 }
 0x101   : > { %v494_v11 = vadd.f32 %v489_v10, %v478_v8  ;;  %v504_v12 = vadd.f32 %v619_v7, %v495_v9 }
 0x103   : > { %v503_v13 = vadd.f32 %v619_v7, %v494_v11  ;;  %v506_v14 = vmax.f32 %v504_v12, 0.0 }
 0x105   : > { %v505_v15 = vmax.f32 %v503_v13, 0.0  ;;  %508 = vst [vmem:[%s177_s19 + $0x8] sm:$0xff] %v506_v14 }
 0x107   : > { %507 = vst [vmem:[%s177_s19] sm:$0xff] %v505_v15 }
 0x108   : > { %712 = shalt.err (!%p709_p5)
}
 0x109   : > { %s713_s5 = scalar_lea.hbm %s880_s27, 256  ;;  %s717_s8 = scalar_lea.hbm %s934_s3, 512 }
 0x10a   : > { %p714_p6 = scmp.ne.s32.totalorder %s880_s27, %s713_s5  ;;  %p718_p10 = scmp.lt.s32.totalorder %s880_s27, %s934_s3 }
 0x10b   : > { %p719_p11 = scmp.lt.s32.totalorder %s717_s8, %s713_s5 }
 0x10c   : > { %p715_p7 = pnand %p714_p6, %p842_p4 }
 0x10d   : > { %p720_p12 = por %p719_p11, %p718_p10 }
 0x10e   : > { %p716_p9 = pneg %p715_p7 }
 0x110   : > { %p721_p13 = pnand %p720_p12, %p716_p9 }
 0x112   : > { %724 = shalt.err (!%p721_p13)
}
 0x113   : > { %s780_s11 = smov 128   ;;  %s781_s18 = smov 8  }
 0x114   : > { %637 = dma.vmem_to_hbm [thread:$0]  (%p842_p4), %s882_s21, 256, %s880_s27, %s886_s28, %s780_s11, %s780_s11, %s781_s18  }
 0x115 PF: > { %p643_p0 = scmp.ge.s32.totalorder %s775_s17, 2  ;;  %s540_s19 = sand.u32 1, %s755_s12  }
 0x116   : > { %s541_s23 = scalar_lea.sflag [#allocation4], %s540_s19 }
 0x117   : > { %p640_p1 = pnand %p643_p0, %p849_p8 }
 0x119   : > { %p641_p2 = pneg %p640_p1 }
 0x11b   : > { %750 = dma.done.wait (%p641_p2), %s541_s23, 256  }
 0x11c   : > { %752 = vsyncadd (%p641_p2), %s541_s23, 4294967040  ;;  %s16_s17 = sadd.s32 1, %s775_s17   ;;  %s937_s12 = smov %s759_s13 }
 0x11d   : > { %p13_p3 = scmp.ge.s32.totalorder %s16_s17, 4   ;;  %s938_s13 = smov %s763_s14 }
 0x11e   : > { %s939_s14 = smov %s855_s25  ;;  %s940_s15 = smov %s771_s16 }
 0x11f   : > { %s941_s16 = smov %s943_s20  ;;  %15 = sbr.rel (!%p13_p3) target bundleno = 4 (0x4), region = 68 }
 0x124   :  { %546 = vsyncpa [#allocation4], 1 }
 0x125   :  { %548 = vsyncpa [#allocation4 + $0x1], 1 }

</bundles_post_ra>
